<compile_context>
chip_gen: v7x
topology: tpu7x:2x2x1
jax: 0.10.0
libtpu: 0.0.40
codegen_flags: <defaults>
</compile_context>

<pallas_src>
import functools

import jax
import jax.numpy as jnp
from jax.experimental import pallas as pl
from jax.experimental.pallas import tpu as pltpu


_LANE = 128
_TILE_BYTES_TARGET = 2 * 1024 * 1024      # ~2 MiB of x per streamed tile
_FUSED_VMEM_BUDGET = 24 * 1024 * 1024     # conservative: fits v7x (64 MiB phys)
_VMEM_LIMIT_CAP = 48 * 1024 * 1024


def _round_up(v, m):
    return (v + m - 1) // m * m


def _pick_length_tile(c, l, itemsize):
    """Return (tl, lp): streamed tile length and padded length (lp % tl == 0).

    tl is a multiple of 128 (unmasked, lane-dense stores) unless it is the full
    length; it targets ~_TILE_BYTES_TARGET bytes of x per tile so the fixed
    per-grid-step overhead (~0.35us) is amortized.
    """
    if c * l * itemsize <= _TILE_BYTES_TARGET or l < _LANE:
        return l, l                                   # whole length, one tile
    tl_cap = max(_LANE, (_TILE_BYTES_TARGET // (c * itemsize)) // _LANE * _LANE)
    if l % _LANE == 0:
        tl = min(tl_cap, l)
        while l % tl:                 # largest 128-multiple divisor <= cap
            tl -= _LANE
        return tl, l
    # L not a multiple of 128 and too big for one tile: pad to a tile multiple.
    tl = min(tl_cap, _round_up(l, _LANE))
    return tl, _round_up(l, tl)


# ----------------------------------------------------------------------------
# Fused kernel: squeeze + excite + scale with a batch-resident output slab.
# ----------------------------------------------------------------------------
def _fused_se_kernel(x_ref, w1_ref, w2_ref, o_ref, acc_ref, *, inv_l, tl, lp):
    li = pl.program_id(1)

    @pl.when(li == 0)
    def _():
        acc_ref[...] = jnp.zeros_like(acc_ref)

    # Stage the streamed tile straight into the batch-resident output slab so
    # x is read from HBM exactly once.
    if tl == lp:                                      # single tile per batch
        o_ref[...] = x_ref[...]
    else:                                             # tl is a multiple of 128
        off = pl.multiple_of(li * tl, _LANE)
        o_ref[:, :, pl.ds(off, tl)] = x_ref[...]

    # Length-sum accumulated in f32; 1/L is applied once at finalize.
    acc_ref[...] += jnp.sum(x_ref[0], axis=-1, keepdims=True,
                            dtype=jnp.float32)                     # (C, 1)

    @pl.when(li == pl.num_programs(1) - 1)
    def _():
        y = acc_ref[...] * inv_l                                   # (C, 1) mean
        # PyTorch layouts consumed directly (no transpose):
        #   W1 (H, C) @ y (C, 1) -> (H, 1);  W2 (C, H) @ h (H, 1) -> (C, 1)
        h = jnp.maximum(
            jnp.dot(w1_ref[...].astype(jnp.float32), y,
                    preferred_element_type=jnp.float32), 0.0)
        g = jax.nn.sigmoid(
            jnp.dot(w2_ref[...].astype(jnp.float32), h,
                    preferred_element_type=jnp.float32))
        # Scale the resident slab in the streaming dtype (gate cast once).
        o_ref[...] = o_ref[...] * g.astype(o_ref.dtype)[None]      # (1, C, lp)


# ----------------------------------------------------------------------------
# Fallback pass 1: per-batch channel means only (excitation MLP runs in JAX).
# ----------------------------------------------------------------------------
def _mean_kernel(x_ref, m_ref, acc_ref, *, inv_l):
    li = pl.program_id(1)

    @pl.when(li == 0)
    def _():
        acc_ref[...] = jnp.zeros_like(acc_ref)

    acc_ref[...] += jnp.sum(x_ref[0], axis=-1, keepdims=True, dtype=jnp.float32)

    @pl.when(li == pl.num_programs(1) - 1)
    def _():
        m_ref[...] = (acc_ref[...] * inv_l)[None]                  # (1, C, 1)


# ----------------------------------------------------------------------------
# Fallback pass 2: out = x * gate, gate pre-cast to x.dtype in the wrapper.
# ----------------------------------------------------------------------------
def _scale_kernel(x_ref, g_ref, o_ref):
    o_ref[...] = x_ref[...] * g_ref[...]


def se_blk(x, w1, w2):
    """x: (B, C, L); w1: (C//r, C); w2: (C, C//r) -- PyTorch nn.Linear layout."""
    b, c, l = x.shape
    hdim = w1.shape[0]
    itemsize = jnp.dtype(x.dtype).itemsize

    tl, lp = _pick_length_tile(c, l, itemsize)
    n_l = lp // tl
    inv_l = 1.0 / l

    x_in = x if lp == l else jnp.pad(x, ((0, 0), (0, 0), (0, lp - l)))

    w_bytes = (w1.size * jnp.dtype(w1.dtype).itemsize
               + w2.size * jnp.dtype(w2.dtype).itemsize)
    # Double-buffered resident output slab + double-buffered input tile + misc.
    fused_need = (2 * c * lp + 2 * c * tl) * itemsize + w_bytes + (1 << 20)

    if fused_need <= _FUSED_VMEM_BUDGET:
        # ---------------- Fused single-pass path ----------------
        vmem_limit = min(_VMEM_LIMIT_CAP, max(32 << 20, fused_need + (8 << 20)))
        out = pl.pallas_call(
            functools.partial(_fused_se_kernel, inv_l=inv_l, tl=tl, lp=lp),
            out_shape=jax.ShapeDtypeStruct((b, c, lp), x.dtype),
            grid=(b, n_l),
            in_specs=[
                pl.BlockSpec((1, c, tl), lambda bi, li: (bi, 0, li)),
                pl.BlockSpec((hdim, c), lambda bi, li: (0, 0)),   # resident
                pl.BlockSpec((c, hdim), lambda bi, li: (0, 0)),   # resident
            ],
            out_specs=pl.BlockSpec((1, c, lp), lambda bi, li: (bi, 0, 0)),
            scratch_shapes=[pltpu.VMEM((c, 1), jnp.float32)],
            compiler_params=pltpu.CompilerParams(
                dimension_semantics=("parallel", "arbitrary"),
                vmem_limit_bytes=vmem_limit),
        )(x_in, w1, w2)
    else:
        # ---------------- Fallback: two streamed passes ----------------
        stream_need = 4 * c * tl * itemsize + (1 << 20)
        vmem_limit = min(_VMEM_LIMIT_CAP, max(32 << 20, stream_need + (8 << 20)))

        means = pl.pallas_call(
            functools.partial(_mean_kernel, inv_l=inv_l),
            out_shape=jax.ShapeDtypeStruct((b, c, 1), jnp.float32),
            grid=(b, n_l),
            in_specs=[pl.BlockSpec((1, c, tl), lambda bi, li: (bi, 0, li))],
            out_specs=pl.BlockSpec((1, c, 1), lambda bi, li: (bi, 0, 0)),
            scratch_shapes=[pltpu.VMEM((c, 1), jnp.float32)],
            compiler_params=pltpu.CompilerParams(
                dimension_semantics=("parallel", "arbitrary"),
                vmem_limit_bytes=vmem_limit),
        )(x_in)

        # Excitation MLP: one tiny batched matmul outside the streaming loop.
        y = means[:, :, 0]                                         # (B, C) f32
        h = jnp.maximum(y @ w1.T.astype(jnp.float32), 0.0)
        g = jax.nn.sigmoid(h @ w2.T.astype(jnp.float32))
        gates = g.astype(x.dtype)[:, :, None]                      # (B, C, 1)

        out = pl.pallas_call(
            _scale_kernel,
            out_shape=jax.ShapeDtypeStruct((b, c, lp), x.dtype),
            grid=(b, n_l),
            in_specs=[
                pl.BlockSpec((1, c, tl), lambda bi, li: (bi, 0, li)),
                pl.BlockSpec((1, c, 1), lambda bi, li: (bi, 0, 0)),
            ],
            out_specs=pl.BlockSpec((1, c, tl), lambda bi, li: (bi, 0, li)),
            compiler_params=pltpu.CompilerParams(
                dimension_semantics=("parallel", "parallel"),
                vmem_limit_bytes=vmem_limit),
        )(x_in, gates)

    return out if lp == l else out[:, :, :l]


def se_blk_ref(x, w1, w2):
    """Pure-JAX reference mirroring the PyTorch forward."""
    y = jnp.mean(x.astype(jnp.float32), axis=-1)
    h = jnp.maximum(y @ w1.T.astype(jnp.float32), 0.0)
    s = jax.nn.sigmoid(h @ w2.T.astype(jnp.float32))
    return (x.astype(jnp.float32) * s[:, :, None]).astype(x.dtype)


if __name__ == "__main__":
    # Small shapes consistent with the module: batch=2, channels=64,
    # length=128, reduction=16 -> hidden=4.
    B, C, L, R = 2, 64, 128, 16
    H = C // R

    key = jax.random.PRNGKey(0)
    kx, k1, k2 = jax.random.split(key, 3)

    x = jax.random.normal(kx, (B, C, L), dtype=jnp.float32)
    # PyTorch nn.Linear layout: (out_features, in_features).
    w1 = jax.random.normal(k1, (H, C), dtype=jnp.float32) * 0.1
    w2 = jax.random.normal(k2, (C, H), dtype=jnp.float32) * 0.1

    out = jax.block_until_ready(se_blk(x, w1, w2))
    ref = se_blk_ref(x, w1, w2)

    assert out.shape == (B, C, L)
    assert jnp.allclose(out, ref, atol=1e-5, rtol=1e-5)

    print("KERNEL_OK")
</pallas_src>

<mosaic_0001>
module attributes {stable_mosaic.version = 11 : i64} {
  func.func @_fused_se_kernel(%arg0: i32, %arg1: i32, %arg2: memref<1x64x128xf32, #tpu.memory_space<vmem>>, %arg3: memref<4x64xf32, #tpu.memory_space<vmem>>, %arg4: memref<64x4xf32, #tpu.memory_space<vmem>>, %arg5: memref<1x64x128xf32, #tpu.memory_space<vmem>>, %arg6: memref<64x1xf32, #tpu.memory_space<vmem>>) attributes {dimension_semantics = [#tpu.dimension_semantics<parallel>, #tpu.dimension_semantics<arbitrary>], iteration_bounds = array<i64: 2, 1>, scalar_prefetch = 0 : i64, scratch_operands = 1 : i64, tpu.core_type = #tpu.core_type<tc>, window_params = [{transform_indices = @transform_0, window_bounds = array<i64: 1, 64, 128>}, {pipeline_mode = #tpu.pipeline_mode<synchronous>, transform_indices = @transform_1, window_bounds = array<i64: 4, 64>}, {pipeline_mode = #tpu.pipeline_mode<synchronous>, transform_indices = @transform_2, window_bounds = array<i64: 64, 4>}, {transform_indices = @transform_3, window_bounds = array<i64: 1, 64, 128>}]} {
    %c0_i32 = arith.constant 0 : i32
    %0 = arith.cmpi eq, %arg1, %c0_i32 : i32
    %1 = arith.extui %0 : i1 to i32
    %c0_i32_0 = arith.constant 0 : i32
    %2 = arith.cmpi ne, %1, %c0_i32_0 : i32
    scf.if %2 {
      %cst_15 = arith.constant 0.000000e+00 : f32
      %15 = vector.broadcast %cst_15 : f32 to vector<64x1xf32>
      %c0_16 = arith.constant 0 : index
      %c0_17 = arith.constant 0 : index
      %16 = vector.load %arg6[%c0_16, %c0_17] : memref<64x1xf32, #tpu.memory_space<vmem>>, vector<64x1xf32>
      tpu.vector_store %arg6[%c0_16, %c0_17], %15 {strides = array<i32>} : memref<64x1xf32, #tpu.memory_space<vmem>>, vector<64x1xf32>,
    } else {
    }
    %c0 = arith.constant 0 : index
    %c0_1 = arith.constant 0 : index
    %c0_2 = arith.constant 0 : index
    %3 = vector.load %arg2[%c0, %c0_1, %c0_2] : memref<1x64x128xf32, #tpu.memory_space<vmem>>, vector<1x64x128xf32>
    %c0_3 = arith.constant 0 : index
    %c0_4 = arith.constant 0 : index
    %c0_5 = arith.constant 0 : index
    %4 = vector.load %arg5[%c0_3, %c0_4, %c0_5] : memref<1x64x128xf32, #tpu.memory_space<vmem>>, vector<1x64x128xf32>
    tpu.vector_store %arg5[%c0_3, %c0_4, %c0_5], %3 {strides = array<i32>} : memref<1x64x128xf32, #tpu.memory_space<vmem>>, vector<1x64x128xf32>,
    %c0_6 = arith.constant 0 : index
    %c0_7 = arith.constant 0 : index
    %5 = vector.load %arg6[%c0_6, %c0_7] : memref<64x1xf32, #tpu.memory_space<vmem>>, vector<64x1xf32>
    %c0_8 = arith.constant 0 : index
    %c0_9 = arith.constant 0 : index
    %c0_10 = arith.constant 0 : index
    %6 = vector.load %arg2[%c0_8, %c0_9, %c0_10] : memref<1x64x128xf32, #tpu.memory_space<vmem>>, vector<1x64x128xf32>
    %7 = vector.shape_cast %6 : vector<1x64x128xf32> to vector<64x128xf32>
    %cst = arith.constant dense<0.000000e+00> : vector<64xf32>
    %8 = vector.multi_reduction <add>, %7, %cst [1] : vector<64x128xf32> to vector<64xf32>
    %9 = vector.shape_cast %8 : vector<64xf32> to vector<64x1xf32>
    %10 = arith.addf %5, %9 : vector<64x1xf32>
    %c0_11 = arith.constant 0 : index
    %c0_12 = arith.constant 0 : index
    %11 = vector.load %arg6[%c0_11, %c0_12] : memref<64x1xf32, #tpu.memory_space<vmem>>, vector<64x1xf32>
    tpu.vector_store %arg6[%c0_11, %c0_12], %10 {strides = array<i32>} : memref<64x1xf32, #tpu.memory_space<vmem>>, vector<64x1xf32>,
    %c0_i32_13 = arith.constant 0 : i32
    %12 = arith.cmpi eq, %arg1, %c0_i32_13 : i32
    %13 = arith.extui %12 : i1 to i32
    %c0_i32_14 = arith.constant 0 : i32
    %14 = arith.cmpi ne, %13, %c0_i32_14 : i32
    scf.if %14 {
      %c0_15 = arith.constant 0 : index
      %c0_16 = arith.constant 0 : index
      %15 = vector.load %arg6[%c0_15, %c0_16] : memref<64x1xf32, #tpu.memory_space<vmem>>, vector<64x1xf32>
      %cst_17 = arith.constant 7.812500e-03 : f32
      %16 = vector.broadcast %cst_17 : f32 to vector<64x1xf32>
      %17 = arith.mulf %15, %16 : vector<64x1xf32>
      %c0_18 = arith.constant 0 : index
      %c0_19 = arith.constant 0 : index
      %18 = vector.load %arg3[%c0_18, %c0_19] : memref<4x64xf32, #tpu.memory_space<vmem>>, vector<4x64xf32>
      %cst_20 = arith.constant dense<0.000000e+00> : vector<4x1xf32>
      %19 = tpu.matmul %18, %17, %cst_20 {dimension_numbers = #tpu.dot_dimension_numbers<[1], [0], [0], [1], [0, 0, 1, 1], [], []>} : vector<4x64xf32>, vector<64x1xf32>, vector<4x1xf32> -> vector<4x1xf32>
      %cst_21 = arith.constant 0.000000e+00 : f32
      %20 = vector.broadcast %cst_21 : f32 to vector<4x1xf32>
      %21 = arith.maximumf %19, %20 : vector<4x1xf32>
      %c0_22 = arith.constant 0 : index
      %c0_23 = arith.constant 0 : index
      %22 = vector.load %arg4[%c0_22, %c0_23] : memref<64x4xf32, #tpu.memory_space<vmem>>, vector<64x4xf32>
      %cst_24 = arith.constant dense<0.000000e+00> : vector<64x1xf32>
      %23 = tpu.matmul %22, %21, %cst_24 {dimension_numbers = #tpu.dot_dimension_numbers<[1], [0], [0], [1], [0, 0, 1, 1], [], []>} : vector<64x4xf32>, vector<4x1xf32>, vector<64x1xf32> -> vector<64x1xf32>
      %24 = arith.negf %23 : vector<64x1xf32>
      %25 = math.exp %24 : vector<64x1xf32>
      %cst_25 = arith.constant 1.000000e+00 : f32
      %26 = vector.broadcast %cst_25 : f32 to vector<64x1xf32>
      %27 = arith.addf %26, %25 : vector<64x1xf32>
      %28 = arith.divf %26, %27 : vector<64x1xf32>
      %c0_26 = arith.constant 0 : index
      %c0_27 = arith.constant 0 : index
      %c0_28 = arith.constant 0 : index
      %29 = vector.load %arg5[%c0_26, %c0_27, %c0_28] : memref<1x64x128xf32, #tpu.memory_space<vmem>>, vector<1x64x128xf32>
      %30 = vector.shape_cast %28 : vector<64x1xf32> to vector<1x64x1xf32>
      %31 = vector.broadcast %30 : vector<1x64x1xf32> to vector<1x64x128xf32>
      %32 = arith.mulf %29, %31 : vector<1x64x128xf32>
      %c0_29 = arith.constant 0 : index
      %c0_30 = arith.constant 0 : index
      %c0_31 = arith.constant 0 : index
      %33 = vector.load %arg5[%c0_29, %c0_30, %c0_31] : memref<1x64x128xf32, #tpu.memory_space<vmem>>, vector<1x64x128xf32>
      tpu.vector_store %arg5[%c0_29, %c0_30, %c0_31], %32 {strides = array<i32>} : memref<1x64x128xf32, #tpu.memory_space<vmem>>, vector<1x64x128xf32>,
    } else {
    }
    return
  }
  func.func @transform_0(%arg0: i32, %arg1: i32) -> (i32, i32, i32) {
    %c0_i32 = arith.constant 0 : i32
    %c0_i32_0 = arith.constant 0 : i32
    return %arg0, %c0_i32, %arg1 : i32, i32, i32
  }
  func.func @transform_1(%arg0: i32, %arg1: i32) -> (i32, i32) {
    %c0_i32 = arith.constant 0 : i32
    %c0_i32_0 = arith.constant 0 : i32
    %c0_i32_1 = arith.constant 0 : i32
    return %c0_i32, %c0_i32_0 : i32, i32
  }
  func.func @transform_2(%arg0: i32, %arg1: i32) -> (i32, i32) {
    %c0_i32 = arith.constant 0 : i32
    %c0_i32_0 = arith.constant 0 : i32
    %c0_i32_1 = arith.constant 0 : i32
    return %c0_i32, %c0_i32_0 : i32, i32
  }
  func.func @transform_3(%arg0: i32, %arg1: i32) -> (i32, i32, i32) {
    %c0_i32 = arith.constant 0 : i32
    %c0_i32_0 = arith.constant 0 : i32
    %c0_i32_1 = arith.constant 0 : i32
    return %arg0, %c0_i32, %c0_i32_0 : i32, i32, i32
  }
}

</mosaic_0001>

<bundles_post_ra>
// kernel: tpu_custom_call.1
= control target key start
LH: loop header
LB: loop body
LE: loop exit
PB: predicated region body
PF: predicated region fallthrough
CT: control target
= control target key end

     0   :  { %8 = vsyncpa [#allocation4], 0  ;;  %s1336_s0 = inlined_call_operand.hbm [shape: f32[2,64,128], index: 0, kind: input, shape index: {}]   ;;  %s1337_s1 = inlined_call_operand.vmem [shape: f32[4,64], index: 1, kind: input, shape index: {}]   ;;  %s1338_s2 = inlined_call_operand.vmem [shape: f32[64,4], index: 2, kind: input, shape index: {}]   ;;  %s1339_s3 = inlined_call_operand.hbm [shape: f32[2,64,128], index: 3, kind: output, shape index: {}]  }
   0x1   :  { %10 = vsyncpa [#allocation4 + $0x1], 0 }
   0x2   :  { %11 = vsyncpa [#allocation5], 0 }
   0x3   :  { %13 = vsyncpa [#allocation5 + $0x1], 0  ;;  %s1074_s12 = smov 0   ;;  %s1076_s13 = smov 0  }
   0x4   :  { %s1078_s14 = smov 0   ;;  %s1080_s15 = smov 0  }
   0x5   :  { %s1082_s16 = smov 0   ;;  %s1084_s17 = smov 0  }
   0x6 LB: > { %s728_s18 = sadd.s32 4294967295, %s1042_s17   ;;  %s729_s19 = sadd.s32 4294967294, %s1042_s17   ;;  %s1042_s17 = sphi %s1084_s17, %s19_s17   ;;  %s1038_s16 = sphi %s1082_s16, %s1354_s16   ;;  %s1034_s15 = sphi %s1080_s15, %s1353_s15   ;;  %s1030_s14 = sphi %s1078_s14, %s1352_s14   ;;  %s1026_s13 = sphi %s1076_s13, %s1351_s13   ;;  %s1022_s12 = sphi %s1074_s12, %s1350_s12  }
   0x7   : > { %s31_s20 = sadd.s32 1, %s1038_s16  ;;  %s40_s21 = sadd.s32 1, %s1030_s14 }
   0x8   : > { %p33_p0 = scmp.ge.s32.totalorder %s31_s20, 2  ;;  %p47_p1 = scmp.ne.s32.totalorder %s1030_s14, %s1026_s13 }
   0x9   : > { %p48_p2 = scmp.eq.s32.totalorder %s1042_s17, 0  ;;  %p53_p3 = scmp.ne.s32.totalorder %s1026_s13, %s1022_s12 }
   0xa   : > { %s1356_s20 = smov (%p33_p0, %s31_s20), 0  ;;  %p54_p5 = scmp.eq.s32.totalorder %s728_s18, 0 }
   0xb   : > { %p1115_p4 = por %p48_p2, %p47_p1  ;;  %s35_s23 = ssub.s32 %s1038_s16, %s1356_s20 }
   0xc   : > { %p119_p6 = scmp.eq.s32.totalorder %s728_s18, 1  ;;  %p38_p7 = scmp.eq.s32.totalorder %s35_s23, 0 }
   0xd   : > { %p1121_p8 = por %p54_p5, %p53_p3  ;;  %p125_p10 = scmp.eq.s32.totalorder %s729_s19, 1 }
   0xe   : > { %p1125_p9 = por %p119_p6, %p47_p1  ;;  %p838_p13 = scmp.lt.s32.totalorder %s1042_s17, 2 }
   0xf   : > { %s1130_s26 = scalar_select %p38_p7, %s1030_s14, %s40_s21  }
  0x10   : > { %s1343_s25 = scalar_select %p1125_p9, 1, 0 }
  0x11   : > { %p1132_p11 = por %p125_p10, %p53_p3  ;;  %s151_s28 = sand.u32 1, %s1030_s14  }
  0x12   : > { %s732_s29 = sshll.u32 %s151_s28, 6  ;;  %s761_s30 = sshll.u32 %s1038_s16, 10 }
  0x13   : > { %s1344_s27 = scalar_select %p1132_p11, 1, 0 }
  0x14   : > { %s1143_s6 = scalar_lea.hbm %s1336_s0, %s761_s30  ;;  %s155_s7 = scalar_lea.vmem [#allocation3], %s732_s29 }
  0x15   : > { %s163_s8 = sshll.u32 %s155_s7, 4  ;;  %p1149_p0 = pnand %p838_p13, %p1115_p4  ;;  %s1145_s8 = int_to_ptr.vmem [resolvable:$true] %s163_s8 }
  0x16   : > { %s1154_s10 = scalar_lea.sflag [#allocation4], %s151_s28  ;;  %s930_s11 = scalar_lea.hbm %s1143_s6, 1024 }
  0x17   : > { %p931_p2 = scmp.ne.s32.totalorder %s1143_s6, %s930_s11  ;;  %p932_p3 = pneg %p1149_p0 }
  0x18   : > { %s935_s21 = scalar_lea.hbm %s1336_s0, 2048  ;;  %p936_p4 = scmp.lt.u32.totalorder %s1143_s6, %s1336_s0 }
  0x19   : > { %p933_p5 = pnand %p932_p3, %p931_p2  ;;  %p937_p7 = scmp.lt.u32.totalorder %s935_s21, %s930_s11 }
  0x1a   : > { %p939_p13 = scmp.lt.u32.totalorder %s930_s11, %s1143_s6 }
  0x1b   : > { %p934_p6 = pneg %p933_p5  ;;  %p938_p10 = por %p937_p7, %p936_p4 }
  0x1d   : > { %p940_p12 = por %p939_p13, %p938_p10 }
  0x1f   : > { %p941_p1 = pnand %p940_p12, %p934_p6 }
  0x21   : > { %944 = shalt.err (!%p941_p1)
}
  0x22   : > { %s945_s28 = scalar_lea.vmem %s1145_s8, 1024  ;;  %s1044_s29 = smov [#allocation3]  }
  0x23   : > { %p946_p2 = scmp.ne.s32.totalorder %s1145_s8, %s945_s28  ;;  %s950_s30 = sshll.u32 %s1044_s29, 4  ;;  %s951_s30 = int_to_ptr.vmem [resolvable:$false] %s950_s30 }
  0x24   : > { %s952_s4 = scalar_lea.vmem %s951_s30, 2048  ;;  %p953_p9 = scmp.lt.s32.totalorder %s1145_s8, %s951_s30 }
  0x25   : > { %p948_p5 = pnand %p946_p2, %p932_p3  ;;  %p954_p4 = scmp.lt.s32.totalorder %s952_s4, %s945_s28 }
  0x27   : > { %p949_p11 = pneg %p948_p5  ;;  %p955_p7 = por %p954_p4, %p953_p9 }
  0x29   : > { %p956_p10 = pnand %p955_p7, %p949_p11 }
  0x2b   : > { %959 = shalt.err (!%p956_p10)
}
  0x2c   : > { %s1045_s5 = smov 128   ;;  %s1046_s7 = smov 8  }
  0x2d   : > { %833 = dma.hbm_to_vmem [thread:$0]  (!%p1149_p0), %s1143_s6, 1024, %s1145_s8, %s1154_s10, %s1045_s5, %s1045_s5, %s1046_s7  }
  0x2e   : > { %p171_p12 = scmp.lt.s32.totalorder %s1042_s17, 3  ;;  %p1346_p1 = scmp.ge.s32.totalorder %s1042_s17, 1 }
  0x30   : > { %p172_p3 = pnand %p1346_p1, %p171_p12 }
  0x31   : > { %s1186_s11 = sand.u32 (!%p172_p3), 1, %s1026_s13  }
  0x32   : > { %175 = sbr.rel (%p172_p3) target bundleno = 857 (0x359), region = 32  ;;  %s736_s18 = sshll.u32 (!%p172_p3), %s1186_s11, 6 }
  0x33   : > { %s178_s19 = scalar_lea.sflag (!%p172_p3), [#allocation4], %s1186_s11  ;;  %s181_s21 = scalar_lea.vmem (!%p172_p3), [#allocation3], %s736_s18 }
  0x39   : > { %1013 = dma.done.wait (%p1121_p8), %s178_s19, 1024  }
  0x3a   : > { %1015 = vsyncadd (%p1121_p8), %s178_s19, 4294966272  ;;  %vm208_vm0 = vcmask 7168   ;;  %v1047_v0 = vmov 0.0   ;;  %v1204_v1 = vld [vmem:[%s181_s21 + $0x10] sm:$0xff]  ;;  %v1206_v2 = vld [vmem:[%s181_s21] sm:$0xff]  ;;  %v1048_v9 = vmov 0.0|0.0  }
  0x3b   : > { %211 = vst.msk [vmem:[#allocation2 + $0x10] sm:$0xff] %vm208_vm0, %v1047_v0  ;;  %209 = vst.msk [vmem:[#allocation2] sm:$0xff] %vm208_vm0, %v1047_v0  ;;  %253 = vadd.xlane.f32.xlu1 %v1204_v1  ;;  %249 = vadd.xlane.f32.xlu0 %v1206_v2  ;;  %v1210_v3 = vld [vmem:[%s181_s21 + $0x18] sm:$0xff]  ;;  %v1212_v4 = vld [vmem:[%s181_s21 + $0x8] sm:$0xff]  ;;  %vm1049_vm1 = vmmov 0   ;;  %vm302_vm2 = vcmask 523264  }
  0x3c   : > { %210 = vst.msk [vmem:[#allocation2 + $0x8] sm:$0xff] %vm208_vm0, %v1047_v0  ;;  %212 = vst.msk [vmem:[#allocation2 + $0x18] sm:$0xff] %vm208_vm0, %v1047_v0  ;;  %v1216_v5 = vld [vmem:[%s181_s21 + $0x28] sm:$0xff]  ;;  %v1218_v6 = vld [vmem:[%s181_s21 + $0x20] sm:$0xff]  ;;  %814 = vmatprep.subr.bf16.mxu0 %v1048_v9  ;;  %797 = vmatprep.mubr.msk.f32.mxu0 %vm1049_vm1, %v1047_v0  ;;  %vm385_vm3 = vcmask 31744   ;;  %vm410_vm4 = vcmask 1043456  }
  0x3d   : > { %213 = vst.msk [vmem:[#allocation2 + $0x20] sm:$0xff] %vm208_vm0, %v1047_v0  ;;  %214 = vst.msk [vmem:[#allocation2 + $0x28] sm:$0xff] %vm208_vm0, %v1047_v0  ;;  %v1222_v7 = vld [vmem:[%s181_s21 + $0x38] sm:$0xff]  ;;  %v1224_v8 = vld [vmem:[%s181_s21 + $0x30] sm:$0xff]  ;;  %s203_s9 = scalar_lea.vmem [#allocation6], %s736_s18  ;;  %s762_s18 = sshll.u32 %s1034_s15, 10 }
  0x3e   : > { %215 = vst.msk [vmem:[#allocation2 + $0x30] sm:$0xff] %vm208_vm0, %v1047_v0  ;;  %216 = vst.msk [vmem:[#allocation2 + $0x38] sm:$0xff] %vm208_vm0, %v1047_v0  ;;  %v301_v54 = vld [vmem:[%s1337_s1] sm:$0xf]  ;;  %v378_v59 = vld [vmem:[%s1338_s2 + $0x8] sm:$0xff]  ;;  %s645_s10 = sshll.u32 %s203_s9, 4  ;;  %s1284_s28 = scalar_lea.hbm %s1339_s3, %s762_s18  ;;  %s1286_s10 = int_to_ptr.vmem [resolvable:$true] %s645_s10 }
  0x3f   : > { %255 = vadd.xlane.f32.xlu1 %v1210_v3  ;;  %251 = vadd.xlane.f32.xlu0 %v1212_v4  ;;  %v377_v55 = vld [vmem:[%s1338_s2] sm:$0xff]  ;;  %v379_v60 = vld [vmem:[%s1338_s2 + $0x10] sm:$0xff]  ;;  %v380_v61 = vld [vmem:[%s1338_s2 + $0x18] sm:$0xff]  ;;  %s632_s29 = scalar_lea.sflag [#allocation5], %s1186_s11  ;;  %s960_s30 = scalar_lea.vmem %s1286_s10, 1024 }
  0x40   : > { %802 = vmatprep.mubr.msk.f32.mxu1 %vm385_vm3, %v377_v55  ;;  %v381_v62 = vld [vmem:[%s1338_s2 + $0x20] sm:$0xff]  ;;  %v382_v63 = vld [vmem:[%s1338_s2 + $0x28] sm:$0xff]  ;;  %v383_v0 = vld [vmem:[%s1338_s2 + $0x30] sm:$0xff]  ;;  %p961_p8 = scmp.ne.s32.totalorder %s1286_s10, %s960_s30  ;;  %p1347_p9 = scmp.ne.s32.totalorder %s1343_s25, 0 }
  0x41   : > { %s1051_s15 = smov [#allocation6]  }
  0x42   : > { %v235_v10 = vld [vmem:[#allocation2 + $0x10] sm:$0xff]  ;;  %v233_v11 = vld [vmem:[#allocation2] sm:$0xff]  ;;  %p962_p11 = pnand %p961_p8, %p1347_p9  ;;  %s964_s4 = sshll.u32 %s1051_s15, 4  ;;  %s965_s4 = int_to_ptr.vmem [resolvable:$false] %s964_s4 }
  0x43   : > { %259 = vadd.xlane.f32.xlu1 %v1216_v5  ;;  %257 = vadd.xlane.f32.xlu0 %v1218_v6  ;;  %v236_v16 = vld [vmem:[#allocation2 + $0x18] sm:$0xff]  ;;  %v234_v17 = vld [vmem:[#allocation2 + $0x8] sm:$0xff]  ;;  %s966_s5 = scalar_lea.vmem %s965_s4, 2048  ;;  %p967_p6 = scmp.lt.s32.totalorder %s1286_s10, %s965_s4 }
  0x44   : > { %v238_v22 = vld [vmem:[#allocation2 + $0x28] sm:$0xff]  ;;  %v237_v23 = vld [vmem:[#allocation2 + $0x20] sm:$0xff]  ;;  %p963_p0 = pneg %p962_p11  ;;  %p968_p13 = scmp.lt.s32.totalorder %s966_s5, %s960_s30 }
  0x45   : > { %v240_v28 = vld [vmem:[#allocation2 + $0x38] sm:$0xff]  ;;  %v239_v29 = vld [vmem:[#allocation2 + $0x30] sm:$0xff] }
  0x46   : > { %p969_p2 = por %p968_p13, %p967_p6 }
  0x47   : > { %263 = vadd.xlane.f32.xlu1 %v1222_v7  ;;  %261 = vadd.xlane.f32.xlu0 %v1224_v8 }
  0x48   : > { %p970_p5 = pnand %p969_p2, %p963_p0 }
  0xc8   : > { %v254_v12 = vpop.xlane.xlu1 %253  ;;  %v250_v13 = vpop.xlane.xlu0 %249 }
  0xc9   : > { %v267_v14 = vadd.f32 %v254_v12, %v235_v10  ;;  %v265_v15 = vadd.f32 %v250_v13, %v233_v11  ;;  %v1050_v10 = vmov 0  }
  0xca   : > { %897 = vset.pattern.permute.xlu1 %v1050_v10  ;;  %896 = vset.pattern.permute.xlu0 %v1050_v10 }
  0xcb   : > { %276 = vst.msk [vmem:[#allocation2 + $0x10] sm:$0xff] %vm208_vm0, %v267_v14  ;;  %274 = vst.msk [vmem:[#allocation2] sm:$0xff] %vm208_vm0, %v265_v15 }
  0xcc   : > { %v256_v18 = vpop.xlane.xlu1 %255  ;;  %v252_v19 = vpop.xlane.xlu0 %251 }
  0xcd   : > { %v268_v20 = vadd.f32 %v256_v18, %v236_v16  ;;  %v266_v21 = vadd.f32 %v252_v19, %v234_v17 }
  0xcf   : > { %277 = vst.msk [vmem:[#allocation2 + $0x18] sm:$0xff] %vm208_vm0, %v268_v20  ;;  %275 = vst.msk [vmem:[#allocation2 + $0x8] sm:$0xff] %vm208_vm0, %v266_v21 }
  0xd0   : > { %v260_v24 = vpop.xlane.xlu1 %259  ;;  %v258_v25 = vpop.xlane.xlu0 %257 }
  0xd1   : > { %v270_v26 = vadd.f32 %v260_v24, %v238_v22  ;;  %v269_v27 = vadd.f32 %v258_v25, %v237_v23 }
  0xd2   : > { %v285_v32 = vld [vmem:[#allocation2] sm:$0xff]  ;;  %v287_v36 = vld [vmem:[#allocation2 + $0x10] sm:$0xff] }
  0xd3   : > { %279 = vst.msk [vmem:[#allocation2 + $0x28] sm:$0xff] %vm208_vm0, %v270_v26  ;;  %278 = vst.msk [vmem:[#allocation2 + $0x20] sm:$0xff] %vm208_vm0, %v269_v27  ;;  %v293_v38 = vmul.f32 0.0078125, %v285_v32  ;;  %v295_v41 = vmul.f32 0.0078125, %v287_v36 }
  0xd4   : > { %v264_v30 = vpop.xlane.xlu1 %263  ;;  %v262_v31 = vpop.xlane.xlu0 %261 }
  0xd5   : > { %v272_v33 = vadd.f32 %v264_v30, %v240_v28  ;;  %v271_v34 = vadd.f32 %v262_v31, %v239_v29 }
  0xd6   : > { %v286_v35 = vld [vmem:[#allocation2 + $0x8] sm:$0xff]  ;;  %v288_v37 = vld [vmem:[#allocation2 + $0x18] sm:$0xff] }
  0xd7   : > { %281 = vst.msk [vmem:[#allocation2 + $0x38] sm:$0xff] %vm208_vm0, %v272_v33  ;;  %280 = vst.msk [vmem:[#allocation2 + $0x30] sm:$0xff] %vm208_vm0, %v271_v34  ;;  %v294_v39 = vmul.f32 0.0078125, %v286_v35  ;;  %v296_v42 = vmul.f32 0.0078125, %v288_v37 }
  0xd9   : > { %v815_v40 = vpack.c.bf16 %v294_v39, %v293_v38  ;;  %v818_v47 = vpack.c.bf16 %v296_v42, %v295_v41 }
  0xda   : > { %v289_v43 = vld [vmem:[#allocation2 + $0x20] sm:$0xff]  ;;  %v290_v44 = vld [vmem:[#allocation2 + $0x28] sm:$0xff] }
  0xdb   : > { %816 = vmatpush3.bf16.msra.mxu0 %v815_v40  ;;  %v297_v45 = vmul.f32 0.0078125, %v289_v43  ;;  %v298_v46 = vmul.f32 0.0078125, %v290_v44 }
  0xdc   : > { %817 = vmatprep.subr.bf16.mxu0 %v1048_v9 }
  0xdd   : > { %v821_v50 = vpack.c.bf16 %v298_v46, %v297_v45 }
  0xde   : > { %v291_v48 = vld [vmem:[#allocation2 + $0x30] sm:$0xff]  ;;  %v292_v49 = vld [vmem:[#allocation2 + $0x38] sm:$0xff] }
  0xdf   : > { %819 = vmatpush3.bf16.msra.mxu0 %v818_v47  ;;  %v299_v51 = vmul.f32 0.0078125, %v291_v48  ;;  %v300_v52 = vmul.f32 0.0078125, %v292_v49 }
  0xe0   : > { %820 = vmatprep.subr.bf16.mxu0 %v1048_v9 }
  0xe1   : > { %v824_v53 = vpack.c.bf16 %v300_v52, %v299_v51 }
  0xe3   : > { %822 = vmatpush3.bf16.msra.mxu0 %v821_v50 }
  0xe4   : > { %823 = vmatprep.subr.bf16.mxu0 %v1048_v9  ;;  %v384_v9 = vld [vmem:[%s1338_s2 + $0x38] sm:$0xff] }
  0xe7   : > { %825 = vmatpush3.bf16.msra.mxu0 %v824_v53 }
  0xea   : > { %798 = vmatmul.mubr.msk.f32.vlgmr.msra.gmra.mrb[0].mxu0 %vm302_vm2, %v301_v54 }
 0x1bd   : > { %v372_v56 = vpop.f32.mrb[0].mxu0 }
 0x1be   : > { %v376_v57 = vmax.f32 %v372_v56, 0.0  ;;  %v799_v58 = vpop.f32.mrb[1].mxu0 }
 0x1c0   : > { %800 = vmatprep.subr.msk.mxu1 %vm410_vm4, %v376_v57 }
 0x1c1   : > { %801 = vmatpush3.msk.msra.mxu1 %vm410_vm4, %v376_v57 }
 0x1c2   : > { %803 = vmatmul.mubr.msk.f32.vlgmr.msra.gmra.mrb[0].mxu1 %vm385_vm3, %v378_v59 }
 0x1c3   : > { %805 = vmatprep.mubr.msk.f32.mxu1 %vm385_vm3, %v379_v60 }
 0x1c6   : > { %806 = vmatmul.mubr.msk.f32.gmra.mrb[2].mxu1 %vm385_vm3, %v380_v61 }
 0x1c7   : > { %808 = vmatprep.mubr.msk.f32.mxu1 %vm385_vm3, %v381_v62 }
 0x1ca   : > { %809 = vmatmul.mubr.msk.f32.gmra.mrb[4].mxu1 %vm385_vm3, %v382_v63 }
 0x1cb   : > { %811 = vmatprep.mubr.msk.f32.mxu1 %vm385_vm3, %v383_v0 }
 0x1ce   : > { %812 = vmatmul.mubr.msk.f32.gmra.mrb[6].mxu1 %vm385_vm3, %v384_v9 }
 0x295   : > { %v804_v11 = vpop.f32.mrb[0].mxu1 }
 0x296   : > { %v749_v12 = vmul.f32 -1.442695, %v804_v11  ;;  %v480_v13 = vpop.f32.mrb[1].mxu1 }
 0x297   : > { %v748_v14 = vmul.f32 -1.442695, %v480_v13 }
 0x298   : > { %898 = vpow2.f32 %v749_v12 }
 0x299   : > { %900 = vpow2.f32 %v748_v14  ;;  %v807_v15 = vpop.f32.mrb[2].mxu1 }
 0x29a   : > { %v751_v16 = vmul.f32 -1.442695, %v807_v15  ;;  %v490_v17 = vpop.f32.mrb[3].mxu1 }
 0x29b   : > { %v750_v18 = vmul.f32 -1.442695, %v490_v17 }
 0x29c   : > { %902 = vpow2.f32 %v751_v16 }
 0x29d   : > { %904 = vpow2.f32 %v750_v18  ;;  %v810_v19 = vpop.f32.mrb[4].mxu1 }
 0x29e   : > { %v753_v20 = vmul.f32 -1.442695, %v810_v19  ;;  %v500_v21 = vpop.f32.mrb[5].mxu1 }
 0x29f   : > { %v752_v22 = vmul.f32 -1.442695, %v500_v21 }
 0x2a0   : > { %906 = vpow2.f32 %v753_v20 }
 0x2a1   : > { %v813_v23 = vpop.f32.mrb[6].mxu1  ;;  %908 = vpow2.f32 %v752_v22 }
 0x2a2   : > { %v899_v24 = vpop.eup %898  ;;  %v510_v25 = vpop.f32.mrb[7].mxu1  ;;  %v755_v33 = vmul.f32 -1.442695, %v813_v23 }
 0x2a3   : > { %v901_v26 = vpop.eup %900  ;;  %v544_v27 = vadd.f32 1.0, %v899_v24  ;;  %v754_v28 = vmul.f32 -1.442695, %v510_v25 }
 0x2a4   : > { %v543_v29 = vadd.f32 1.0, %v901_v26 }
 0x2a5   : > { %910 = vrcp.f32 %v544_v27 }
 0x2a6   : > { %v903_v30 = vpop.eup %902  ;;  %912 = vrcp.f32 %v543_v29 }
 0x2a7   : > { %v905_v31 = vpop.eup %904  ;;  %v546_v32 = vadd.f32 1.0, %v903_v30  ;;  %914 = vpow2.f32 %v754_v28 }
 0x2a8   : > { %v545_v34 = vadd.f32 1.0, %v905_v31 }
 0x2a9   : > { %916 = vrcp.f32 %v546_v32 }
 0x2aa   : > { %v907_v35 = vpop.eup %906  ;;  %918 = vpow2.f32 %v755_v33 }
 0x2ab   : > { %v548_v36 = vadd.f32 1.0, %v907_v35  ;;  %920 = vrcp.f32 %v545_v34  ;;  %v909_v37 = vpop.eup %908 }
 0x2ac   : > { %v547_v41 = vadd.f32 1.0, %v909_v37 }
 0x2ad   : > { %922 = vrcp.f32 %v548_v36 }
 0x2ae   : > { %924 = vrcp.f32 %v547_v41 }
 0x2af   : > { %v911_v38 = vpop.eup %910 }
 0x2b0   : > { %v913_v39 = vpop.eup %912  ;;  %582 = vperm.xlu1 %897, %v911_v38  }
 0x2b1   : > { %v915_v40 = vpop.eup %914  ;;  %577 = vperm.xlu0 %896, %v913_v39  }
 0x2b2   : > { %v549_v43 = vadd.f32 1.0, %v915_v40 }
 0x2b3   : > { %v917_v42 = vpop.eup %916 }
 0x2b4   : > { %592 = vperm.xlu1 %897, %v917_v42   ;;  %v919_v44 = vpop.eup %918  ;;  %926 = vrcp.f32 %v549_v43 }
 0x2b5   : > { %v921_v45 = vpop.eup %920  ;;  %v550_v47 = vadd.f32 1.0, %v919_v44 }
 0x2b7   : > { %v923_v46 = vpop.eup %922  ;;  %928 = vrcp.f32 %v550_v47 }
 0x2b8   : > { %587 = vperm.xlu1 %897, %v921_v45   ;;  %v925_v48 = vpop.eup %924 }
 0x2bc   : > { %602 = vperm.xlu1 %897, %v923_v46  }
 0x2be   : > { %v927_v49 = vpop.eup %926 }
 0x2c0   : > { %597 = vperm.xlu1 %897, %v925_v48  }
 0x2c1   : > { %v929_v50 = vpop.eup %928 }
 0x2c4   : > { %607 = vperm.xlu1 %897, %v927_v49  }
 0x2c8   : > { %612 = vperm.xlu1 %897, %v929_v50  }
 0x32f   : > { %v583_v51 = vpop.permute.xlu1 %582 }
 0x330   : > { %v616_v52 = vmul.f32 %v583_v51, %v1212_v4  ;;  %v578_v53 = vpop.permute.xlu0 %577 }
 0x331   : > { %v615_v54 = vmul.f32 %v578_v53, %v1206_v2 }
 0x332   : > { %624 = vst [vmem:[%s203_s9 + $0x8] sm:$0xff] %v616_v52 }
 0x333   : > { %623 = vst [vmem:[%s203_s9] sm:$0xff] %v615_v54  ;;  %v593_v55 = vpop.permute.xlu1 %592 }
 0x334   : > { %v618_v56 = vmul.f32 %v593_v55, %v1210_v3 }
 0x336   : > { %626 = vst [vmem:[%s203_s9 + $0x18] sm:$0xff] %v618_v56 }
 0x337   : > { %v588_v57 = vpop.permute.xlu1 %587 }
 0x338   : > { %v617_v58 = vmul.f32 %v588_v57, %v1204_v1 }
 0x33a   : > { %625 = vst [vmem:[%s203_s9 + $0x10] sm:$0xff] %v617_v58 }
 0x33b   : > { %v603_v59 = vpop.permute.xlu1 %602 }
 0x33c   : > { %v620_v4 = vmul.f32 %v603_v59, %v1216_v5 }
 0x33e   : > { %628 = vst [vmem:[%s203_s9 + $0x28] sm:$0xff] %v620_v4 }
 0x33f   : > { %v598_v60 = vpop.permute.xlu1 %597 }
 0x340   : > { %v619_v2 = vmul.f32 %v598_v60, %v1218_v6 }
 0x342   : > { %627 = vst [vmem:[%s203_s9 + $0x20] sm:$0xff] %v619_v2 }
 0x343   : > { %v608_v61 = vpop.permute.xlu1 %607 }
 0x344   : > { %v621_v62 = vmul.f32 %v608_v61, %v1224_v8 }
 0x346   : > { %629 = vst [vmem:[%s203_s9 + $0x30] sm:$0xff] %v621_v62 }
 0x347   : > { %v613_v3 = vpop.permute.xlu1 %612 }
 0x348   : > { %v622_v1 = vmul.f32 %v613_v3, %v1222_v7 }
 0x34a   : > { %630 = vst [vmem:[%s203_s9 + $0x38] sm:$0xff] %v622_v1 }
 0x34b   : > { %973 = shalt.err (!%p970_p5)
}
 0x34c   : > { %s974_s7 = scalar_lea.hbm %s1284_s28, 1024  ;;  %s978_s24 = scalar_lea.hbm %s1339_s3, 2048 }
 0x34d   : > { %p975_p4 = scmp.ne.s32.totalorder %s1284_s28, %s974_s7  ;;  %p979_p12 = scmp.lt.u32.totalorder %s1284_s28, %s1339_s3 }
 0x34e   : > { %p980_p1 = scmp.lt.u32.totalorder %s978_s24, %s974_s7  ;;  %p982_p8 = scmp.lt.u32.totalorder %s974_s7, %s1284_s28 }
 0x34f   : > { %p976_p7 = pnand %p975_p4, %p1347_p9 }
 0x350   : > { %p981_p3 = por %p980_p1, %p979_p12 }
 0x351   : > { %p977_p10 = pneg %p976_p7 }
 0x352   : > { %p983_p11 = por %p982_p8, %p981_p3 }
 0x354   : > { %p984_p0 = pnand %p983_p11, %p977_p10 }
 0x356   : > { %987 = shalt.err (!%p984_p0)
}
 0x357   : > { %s1052_s9 = smov 128   ;;  %s1053_s18 = smov 8  }
 0x358   : > { %828 = dma.vmem_to_hbm [thread:$0]  (%p1347_p9), %s1286_s10, 1024, %s1284_s28, %s632_s29, %s1052_s9, %s1052_s9, %s1053_s18  }
 0x359 PF: > { %s660_s22 = sand.u32 1, %s1022_s12   ;;  %p1348_p6 = scmp.ne.s32.totalorder %s1344_s27, 0 }
 0x35a   : > { %p1349_p13 = scmp.ge.s32.totalorder %s1042_s17, 2  ;;  %s661_s23 = scalar_lea.sflag [#allocation5], %s660_s22 }
 0x35c   : > { %p835_p2 = pnand %p1349_p13, %p1348_p6 }
 0x35e   : > { %1017 = dma.done.wait (!%p835_p2), %s661_s23, 1024  }
 0x35f   : > { %1019 = vsyncadd (!%p835_p2), %s661_s23, 4294966272  ;;  %s19_s17 = sadd.s32 1, %s1042_s17   ;;  %s1350_s12 = smov %s1026_s13 }
 0x360   : > { %p16_p5 = scmp.ge.s32.totalorder %s19_s17, 4   ;;  %s1351_s13 = smov %s1030_s14 }
 0x361   : > { %s1352_s14 = smov %s1130_s26  ;;  %s1353_s15 = smov %s1038_s16 }
 0x362   : > { %s1354_s16 = smov %s1356_s20  ;;  %18 = sbr.rel (!%p16_p5) target bundleno = 6 (0x6), region = 85 }
 0x369   :  { %666 = vsyncpa [#allocation4], 1 }
 0x36a   :  { %668 = vsyncpa [#allocation4 + $0x1], 1 }
 0x36b   :  { %669 = vsyncpa [#allocation5], 1 }
 0x36c   :  { %671 = vsyncpa [#allocation5 + $0x1], 1 }

</bundles_post_ra>
